<compile_context>
chip_gen: v5e
topology: v5e:2x2
jax: 0.10.0
libtpu: 0.0.40
codegen_flags: <defaults>
</compile_context>

<pallas_src>
import functools

import jax
import jax.numpy as jnp
from jax.experimental import pallas as pl
from jax.experimental.pallas import tpu as pltpu


def _bernoulli_encoder_kernel(x_ref, noise_ref, w1_ref, b1_ref, w2_ref, b2_ref, out_ref):
    """One batch tile: body Linear+ReLU -> head Linear -> +logistic noise -> hard sample."""
    x = x_ref[...]                                                       # [TB, D_in]

    # body: Linear + ReLU
    h = jnp.dot(x, w1_ref[...], preferred_element_type=jnp.float32) + b1_ref[...]
    h = jnp.maximum(h, 0.0)                                              # [TB, H]

    # fc_head logits + logistic noise (same width as output -> plain elementwise add)
    y = jnp.dot(h, w2_ref[...], preferred_element_type=jnp.float32) + b2_ref[...]
    z = y + noise_ref[...]                                               # [TB, N_ABS]

    # hard relaxed-Bernoulli sample: sigmoid((y+L)/T) > 0.5  <=>  y + L > 0  (T > 0)
    out_ref[...] = jnp.where(z > 0.0, 1.0, 0.0).astype(out_ref.dtype)


def _round_up(v, m):
    return ((v + m - 1) // m) * m


@functools.partial(jax.jit, static_argnames=("tile_b",))
def bernoulli_abstract_encoder_forward(x, noise, w1, b1, w2, b2, temperature, *, tile_b=None):
    # `temperature` only scales the relaxed logits; it is sign-preserving (T > 0), so the
    # hard-sample forward value does not depend on it.  Kept in the signature for interface
    # parity with the PyTorch module.
    del temperature

    B, d_in = x.shape
    hidden = w1.shape[1]
    n_abs = w2.shape[1]

    # Batch tiling: >= 2 grid steps when the batch allows (v7x 2-TC sharding + pipeline
    # overlap), tiles a multiple of 8 rows whenever we actually tile, no wrapper-side padding
    # (Pallas masks the ragged last block).
    if tile_b is None:
        tile_b = min(4096, _round_up(max(1, pl.cdiv(B, 2)), 8))
    tile_b = min(tile_b, B)
    if tile_b < B:
        tile_b = min(_round_up(tile_b, 8), B)    # (8,128) sublane constraint for tiled blocks
    grid = (pl.cdiv(B, tile_b),)

    b1r = b1.reshape(1, hidden).astype(jnp.float32)
    b2r = b2.reshape(1, n_abs).astype(jnp.float32)

    const = lambda i: (0, 0)
    cost = pl.CostEstimate(
        flops=2 * B * (d_in * hidden + hidden * n_abs),
        transcendentals=0,
        bytes_accessed=4 * (B * (d_in + 2 * n_abs)
                            + d_in * hidden + hidden + hidden * n_abs + n_abs),
    )

    out = pl.pallas_call(
        _bernoulli_encoder_kernel,
        out_shape=jax.ShapeDtypeStruct((B, n_abs), jnp.float32),
        grid_spec=pltpu.PrefetchScalarGridSpec(
            num_scalar_prefetch=0,
            grid=grid,
            in_specs=[
                pl.BlockSpec((tile_b, d_in), lambda i: (i, 0)),    # x      (streamed)
                pl.BlockSpec((tile_b, n_abs), lambda i: (i, 0)),   # noise  (streamed)
                pl.BlockSpec((d_in, hidden), const),               # w1     (resident)
                pl.BlockSpec((1, hidden), const),                  # b1     (resident)
                pl.BlockSpec((hidden, n_abs), const),              # w2     (resident)
                pl.BlockSpec((1, n_abs), const),                   # b2     (resident)
            ],
            out_specs=pl.BlockSpec((tile_b, n_abs), lambda i: (i, 0)),
        ),
        compiler_params=pltpu.CompilerParams(
            dimension_semantics=("parallel",),     # shard batch tiles across v7x's 2 TCs
            vmem_limit_bytes=32 * 1024 * 1024,     # safe on v5e/v6e/v7x; tiles use far less
        ),
        cost_estimate=cost,
    )(x, noise, w1.astype(jnp.float32), b1r, w2.astype(jnp.float32), b2r)

    return out


def _layer_init(key, fan_in, fan_out, scale=1.0):
    # deterministic orthogonal-ish init stand-in: scaled normal, zero bias
    k_w, _ = jax.random.split(key)
    w = scale * jax.random.normal(k_w, (fan_in, fan_out), jnp.float32) / jnp.sqrt(fan_in)
    b = jnp.zeros((1, fan_out), jnp.float32)
    return w, b


def reference_forward(x, noise, w1, b1, w2, b2, temperature):
    hp = jax.lax.Precision.HIGHEST
    h = jnp.maximum(jnp.dot(x, w1, precision=hp) + b1.reshape(1, -1), 0.0)
    logits = jnp.dot(h, w2, precision=hp) + b2.reshape(1, -1)
    z = (logits + noise) / temperature
    soft = jax.nn.sigmoid(z)
    return (soft > 0.5).astype(jnp.float32), z


if __name__ == "__main__":
    key = jax.random.PRNGKey(0)
    k_x, k_u, k_l1, k_l2 = jax.random.split(key, 4)

    # small shapes consistent with the module: batch=256, state_dim=16, hidden=32, n_abs=8
    B, D_IN, HIDDEN, N_ABS = 256, 16, 32, 8
    TEMPERATURE = 0.5  # temperature.cur

    x = jax.random.normal(k_x, (B, D_IN), jnp.float32)
    u = jax.random.uniform(k_u, (B, N_ABS), jnp.float32, minval=1e-6, maxval=1.0 - 1e-6)
    noise = jnp.log(u) - jnp.log1p(-u)           # logistic noise of the relaxed Bernoulli

    w1, b1 = _layer_init(k_l1, D_IN, HIDDEN)     # body linear
    w2, b2 = _layer_init(k_l2, HIDDEN, N_ABS)    # fc_head

    # default tile_b -> tile_b=128, grid=(2,): the batch-tiled pipeline is actually exercised
    out = bernoulli_abstract_encoder_forward(x, noise, w1, b1, w2, b2, TEMPERATURE)
    out = jax.block_until_ready(out)

    ref_hard, z_ref = reference_forward(x, noise, w1, b1, w2, b2, TEMPERATURE)

    assert out.shape == (B, N_ABS)
    assert bool(jnp.all((out == 0.0) | (out == 1.0)))
    # compare hard samples away from the decision boundary (MXU vs HIGHEST matmul rounding)
    boundary = jnp.abs(z_ref) < 3e-3
    assert float(jnp.mean(boundary)) < 0.02
    assert bool(jnp.all((out == ref_hard) | boundary))

    print("KERNEL_OK")
</pallas_src>

<mosaic_0001>
module attributes {stable_mosaic.version = 11 : i64} {
  func.func @_bernoulli_encoder_kernel(%arg0: i32, %arg1: memref<128x16xf32, #tpu.memory_space<vmem>>, %arg2: memref<128x8xf32, #tpu.memory_space<vmem>>, %arg3: memref<16x32xf32, #tpu.memory_space<vmem>>, %arg4: memref<1x32xf32, #tpu.memory_space<vmem>>, %arg5: memref<32x8xf32, #tpu.memory_space<vmem>>, %arg6: memref<1x8xf32, #tpu.memory_space<vmem>>, %arg7: memref<128x8xf32, #tpu.memory_space<vmem>>) attributes {dimension_semantics = [#tpu.dimension_semantics<parallel>], iteration_bounds = array<i64: 2>, scalar_prefetch = 0 : i64, scratch_operands = 0 : i64, tpu.core_type = #tpu.core_type<tc>, window_params = [{transform_indices = @transform_0, window_bounds = array<i64: 128, 16>}, {transform_indices = @transform_1, window_bounds = array<i64: 128, 8>}, {pipeline_mode = #tpu.pipeline_mode<synchronous>, transform_indices = @transform_2, window_bounds = array<i64: 16, 32>}, {pipeline_mode = #tpu.pipeline_mode<synchronous>, transform_indices = @transform_3, window_bounds = array<i64: 1, 32>}, {pipeline_mode = #tpu.pipeline_mode<synchronous>, transform_indices = @transform_4, window_bounds = array<i64: 32, 8>}, {pipeline_mode = #tpu.pipeline_mode<synchronous>, transform_indices = @transform_5, window_bounds = array<i64: 1, 8>}, {transform_indices = @transform_6, window_bounds = array<i64: 128, 8>}]} {
    %c0 = arith.constant 0 : index
    %c0_0 = arith.constant 0 : index
    %0 = vector.load %arg1[%c0, %c0_0] : memref<128x16xf32, #tpu.memory_space<vmem>>, vector<128x16xf32>
    %c0_1 = arith.constant 0 : index
    %c0_2 = arith.constant 0 : index
    %1 = vector.load %arg3[%c0_1, %c0_2] : memref<16x32xf32, #tpu.memory_space<vmem>>, vector<16x32xf32>
    %cst = arith.constant dense<0.000000e+00> : vector<128x32xf32>
    %2 = tpu.matmul %0, %1, %cst {dimension_numbers = #tpu.dot_dimension_numbers<[1], [0], [0], [1], [0, 0, 1, 1], [], []>} : vector<128x16xf32>, vector<16x32xf32>, vector<128x32xf32> -> vector<128x32xf32>
    %c0_3 = arith.constant 0 : index
    %c0_4 = arith.constant 0 : index
    %3 = vector.load %arg4[%c0_3, %c0_4] : memref<1x32xf32, #tpu.memory_space<vmem>>, vector<1x32xf32>
    %4 = vector.broadcast %3 : vector<1x32xf32> to vector<128x32xf32>
    %5 = arith.addf %2, %4 : vector<128x32xf32>
    %cst_5 = arith.constant 0.000000e+00 : f32
    %6 = vector.broadcast %cst_5 : f32 to vector<128x32xf32>
    %7 = arith.maximumf %5, %6 : vector<128x32xf32>
    %c0_6 = arith.constant 0 : index
    %c0_7 = arith.constant 0 : index
    %8 = vector.load %arg5[%c0_6, %c0_7] : memref<32x8xf32, #tpu.memory_space<vmem>>, vector<32x8xf32>
    %cst_8 = arith.constant dense<0.000000e+00> : vector<128x8xf32>
    %9 = tpu.matmul %7, %8, %cst_8 {dimension_numbers = #tpu.dot_dimension_numbers<[1], [0], [0], [1], [0, 0, 1, 1], [], []>} : vector<128x32xf32>, vector<32x8xf32>, vector<128x8xf32> -> vector<128x8xf32>
    %c0_9 = arith.constant 0 : index
    %c0_10 = arith.constant 0 : index
    %10 = vector.load %arg6[%c0_9, %c0_10] : memref<1x8xf32, #tpu.memory_space<vmem>>, vector<1x8xf32>
    %11 = vector.broadcast %10 : vector<1x8xf32> to vector<128x8xf32>
    %12 = arith.addf %9, %11 : vector<128x8xf32>
    %c0_11 = arith.constant 0 : index
    %c0_12 = arith.constant 0 : index
    %13 = vector.load %arg2[%c0_11, %c0_12] : memref<128x8xf32, #tpu.memory_space<vmem>>, vector<128x8xf32>
    %14 = arith.addf %12, %13 : vector<128x8xf32>
    %cst_13 = arith.constant 0.000000e+00 : f32
    %15 = vector.broadcast %cst_13 : f32 to vector<128x8xf32>
    %16 = arith.cmpf ogt, %14, %15 : vector<128x8xf32>
    %cst_14 = arith.constant 1.000000e+00 : f32
    %cst_15 = arith.constant 0.000000e+00 : f32
    %17 = vector.broadcast %cst_14 : f32 to vector<128x8xf32>
    %18 = vector.broadcast %cst_15 : f32 to vector<128x8xf32>
    %19 = arith.select %16, %17, %18 : vector<128x8xi1>, vector<128x8xf32>
    %c0_16 = arith.constant 0 : index
    %c0_17 = arith.constant 0 : index
    %20 = vector.load %arg7[%c0_16, %c0_17] : memref<128x8xf32, #tpu.memory_space<vmem>>, vector<128x8xf32>
    tpu.vector_store %arg7[%c0_16, %c0_17], %19 {strides = array<i32>} : memref<128x8xf32, #tpu.memory_space<vmem>>, vector<128x8xf32>,
    return
  }
  func.func @transform_0(%arg0: i32) -> (i32, i32) {
    %c0_i32 = arith.constant 0 : i32
    %c0_i32_0 = arith.constant 0 : i32
    return %arg0, %c0_i32 : i32, i32
  }
  func.func @transform_1(%arg0: i32) -> (i32, i32) {
    %c0_i32 = arith.constant 0 : i32
    %c0_i32_0 = arith.constant 0 : i32
    return %arg0, %c0_i32 : i32, i32
  }
  func.func @transform_2(%arg0: i32) -> (i32, i32) {
    %c0_i32 = arith.constant 0 : i32
    %c0_i32_0 = arith.constant 0 : i32
    %c0_i32_1 = arith.constant 0 : i32
    return %c0_i32, %c0_i32_0 : i32, i32
  }
  func.func @transform_3(%arg0: i32) -> (i32, i32) {
    %c0_i32 = arith.constant 0 : i32
    %c0_i32_0 = arith.constant 0 : i32
    %c0_i32_1 = arith.constant 0 : i32
    return %c0_i32, %c0_i32_0 : i32, i32
  }
  func.func @transform_4(%arg0: i32) -> (i32, i32) {
    %c0_i32 = arith.constant 0 : i32
    %c0_i32_0 = arith.constant 0 : i32
    %c0_i32_1 = arith.constant 0 : i32
    return %c0_i32, %c0_i32_0 : i32, i32
  }
  func.func @transform_5(%arg0: i32) -> (i32, i32) {
    %c0_i32 = arith.constant 0 : i32
    %c0_i32_0 = arith.constant 0 : i32
    %c0_i32_1 = arith.constant 0 : i32
    return %c0_i32, %c0_i32_0 : i32, i32
  }
  func.func @transform_6(%arg0: i32) -> (i32, i32) {
    %c0_i32 = arith.constant 0 : i32
    %c0_i32_0 = arith.constant 0 : i32
    return %arg0, %c0_i32 : i32, i32
  }
}

</mosaic_0001>

<bundles_post_ra>
// kernel: bernoulli_abstract_encoder_forward.1
= control target key start
LH: loop header
LB: loop body
LE: loop exit
PB: predicated region body
PF: predicated region fallthrough
CT: control target
= control target key end

     0   :  { %s806_s21 = smov 0   ;;  %s1009_s0 = inlined_call_operand.vmem [shape: f32[256,16], index: 0, kind: input, shape index: {}]   ;;  %s1010_s1 = inlined_call_operand.vmem [shape: f32[256,8], index: 1, kind: input, shape index: {}]   ;;  %s1011_s2 = inlined_call_operand.vmem [shape: f32[16,32], index: 2, kind: input, shape index: {}]   ;;  %s1012_s3 = inlined_call_operand.vmem [shape: f32[1,32], index: 3, kind: input, shape index: {}]   ;;  %s1013_s4 = inlined_call_operand.vmem [shape: f32[32,8], index: 4, kind: input, shape index: {}]   ;;  %s1014_s5 = inlined_call_operand.vmem [shape: f32[1,8], index: 5, kind: input, shape index: {}]   ;;  %s1015_s6 = inlined_call_operand.vmem [shape: f32[256,8], index: 6, kind: output, shape index: {}]  }
   0x1 LB: > { %s700_s22 = sadd.s32 4294967295, %s768_s21   ;;  %p704_p0 = scmp.ge.s32.totalorder %s768_s21, 1  ;;  %s768_s21 = sphi %s806_s21, %s16_s21  }
   0x2   : > { %p224_p1 = scmp.lt.s32.totalorder %s768_s21, 3 }
   0x4   : > { %p225_p2 = pnand %p704_p0, %p224_p1 }
   0x5   : > { %s705_s27 = sshll.u32 (!%p225_p2), %s700_s22, 4 }
   0x6   : > { %228 = sbr.rel (%p225_p2) target bundleno = 404 (0x194), region = 44  ;;  %p260_p3 = scmp.lt.s32.totalorder (!%p225_p2), %s705_s27, 31 }
   0xb   : > { %v294_v0 = vld [vmem:[%s1011_s2 + $0x8] sm:$0xff]  ;;  %v293_v1 = vld [vmem:[%s1011_s2] sm:$0xff]  ;;  %s1017_s27 = smov (!%p260_p3, %s705_s27), 31  ;;  %vm299_vm0 = vcmask 130048   ;;  %v432_v12 = vld [vmem:[%s1013_s4 + $0x18] sm:$0xff]  ;;  %vm437_vm1 = vcmask 261120  }
   0xc   : > { %362 = vmatpush.msra.mxu0 %v294_v0  ;;  %745 = vmatpush.msra.mxu3 %v294_v0  ;;  %s820_s28 = sshll.u32 %s1017_s27, 3  ;;  %v431_v19 = vld [vmem:[%s1013_s4 + $0x10] sm:$0xff]  ;;  %v430_v20 = vld [vmem:[%s1013_s4 + $0x8] sm:$0xff]  ;;  %v429_v21 = vld [vmem:[%s1013_s4] sm:$0xff]  ;;  %vm615_vm2 = vcmask 64512  }
   0xd   : > { %s826_s7 = scalar_lea.vmem %s1009_s0, %s820_s28  ;;  %498 = vmatpush.msra.mxu1 %v432_v12  ;;  %747 = vmatpush.msra.mxu2 %v432_v12  ;;  %v875_v22 = vld [vmem:[%s1012_s3] ss:$0 sm:$0xff]  ;;  %s913_s20 = scalar_lea.vmem %s1010_s1, %s820_s28  ;;  %v770_v12 = vmov 0.0  }
   0xe   : > { %363 = vmatpush.msra.mxu0 %v293_v1  ;;  %746 = vmatpush.msra.mxu3 %v293_v1  ;;  %v277_v2 = vld [vmem:[%s826_s7] sm:$0xff]  ;;  %v278_v3 = vld [vmem:[%s826_s7 + $0x8] sm:$0xff]  ;;  %v279_v4 = vld [vmem:[%s826_s7 + $0x10] sm:$0xff]  ;;  %s926_s26 = scalar_lea.vmem %s1015_s6, %s820_s28 }
   0xf   : > { %711 = vmatmul.msk.f32.vlgmr.msra.gmra.mxu0 %vm299_vm0, %v277_v2  ;;  %v280_v5 = vld [vmem:[%s826_s7 + $0x18] sm:$0xff]  ;;  %v281_v6 = vld [vmem:[%s826_s7 + $0x20] sm:$0xff]  ;;  %v286_v7 = vld [vmem:[%s826_s7 + $0x48] sm:$0xff]  ;;  %499 = vmatpush.msra.mxu1 %v431_v19 }
  0x10   : > { %720 = vmatmul.msk.f32.vlgmr.msra.gmra.mxu3 %vm299_vm0, %v286_v7  ;;  %v282_v8 = vld [vmem:[%s826_s7 + $0x28] sm:$0xff]  ;;  %v287_v9 = vld [vmem:[%s826_s7 + $0x50] sm:$0xff]  ;;  %v288_v11 = vld [vmem:[%s826_s7 + $0x58] sm:$0xff]  ;;  %748 = vmatpush.msra.mxu2 %v431_v19 }
  0x11   : > { %v283_v10 = vld [vmem:[%s826_s7 + $0x30] sm:$0xff]  ;;  %v284_v13 = vld [vmem:[%s826_s7 + $0x38] sm:$0xff]  ;;  %v289_v14 = vld [vmem:[%s826_s7 + $0x60] sm:$0xff]  ;;  %500 = vmatpush.msra.mxu1 %v430_v20 }
  0x12   : > { %v285_v15 = vld [vmem:[%s826_s7 + $0x40] sm:$0xff]  ;;  %v290_v16 = vld [vmem:[%s826_s7 + $0x68] sm:$0xff]  ;;  %v291_v17 = vld [vmem:[%s826_s7 + $0x70] sm:$0xff]  ;;  %749 = vmatpush.msra.mxu2 %v430_v20 }
  0x13   : > { %v292_v18 = vld [vmem:[%s826_s7 + $0x78] sm:$0xff]  ;;  %501 = vmatpush.msra.mxu1 %v429_v21  ;;  %v918_v7 = vld [vmem:[%s1014_s5] ss:$0 sm:$0xff]  ;;  %v553_v20 = vld [vmem:[%s913_s20 + $0x10] sm:$0xff] }
  0x14   : > { %750 = vmatpush.msra.mxu2 %v429_v21 }
  0x17   : > { %712 = vmatmul.msk.f32.gmra.mxu0 %vm299_vm0, %v278_v3 }
  0x18   : > { %721 = vmatmul.msk.f32.gmra.mxu3 %vm299_vm0, %v287_v9  ;;  %v551_v9 = vld [vmem:[%s913_s20] sm:$0xff] }
  0x1f   : > { %713 = vmatmul.msk.f32.gmra.mxu0 %vm299_vm0, %v279_v4 }
  0x20   : > { %722 = vmatmul.msk.f32.gmra.mxu3 %vm299_vm0, %v288_v11 }
  0x27   : > { %714 = vmatmul.msk.f32.gmra.mxu0 %vm299_vm0, %v280_v5 }
  0x28   : > { %723 = vmatmul.msk.f32.gmra.mxu3 %vm299_vm0, %v289_v14 }
  0x2f   : > { %715 = vmatmul.msk.f32.gmra.mxu0 %vm299_vm0, %v281_v6 }
  0x30   : > { %724 = vmatmul.msk.f32.gmra.mxu3 %vm299_vm0, %v290_v16 }
  0x37   : > { %716 = vmatmul.msk.f32.gmra.mxu0 %vm299_vm0, %v282_v8 }
  0x38   : > { %725 = vmatmul.msk.f32.gmra.mxu3 %vm299_vm0, %v291_v17 }
  0x3f   : > { %717 = vmatmul.msk.f32.gmra.mxu0 %vm299_vm0, %v283_v10 }
  0x40   : > { %726 = vmatmul.msk.f32.gmra.mxu3 %vm299_vm0, %v292_v18 }
  0x47   : > { %718 = vmatmul.msk.f32.gmra.mxu0 %vm299_vm0, %v284_v13 }
  0x4f   : > { %719 = vmatmul.msk.f32.gmra.mxu0 %vm299_vm0, %v285_v15  ;;  %v552_v15 = vld [vmem:[%s913_s20 + $0x8] sm:$0xff] }
  0x8c   : > { %v365_v23 = vpop.f32.mrf.mxu0 }
  0x8d   : > { %v366_v24 = vadd.f32 %v875_v22, %v365_v23 }
  0x8f   : > { %v413_v25 = vmax.f32 %v366_v24, 0.0 }
  0x91   : > { %727 = vmatmul.msk.f32.vlgmr.msra.gmra.mxu1 %vm437_vm1, %v413_v25  ;;  %v554_v25 = vld [vmem:[%s913_s20 + $0x18] sm:$0xff] }
  0x93   : > { %v392_v44 = vpop.f32.mrf.mxu3 }
  0x94   : > { %v368_v26 = vpop.f32.mrf.mxu0  ;;  %v393_v52 = vadd.f32 %v875_v22, %v392_v44 }
  0x95   : > { %v369_v27 = vadd.f32 %v875_v22, %v368_v26 }
  0x96   : > { %v422_v53 = vmax.f32 %v393_v52, 0.0 }
  0x97   : > { %v414_v28 = vmax.f32 %v369_v27, 0.0 }
  0x99   : > { %728 = vmatmul.msk.f32.gmra.mxu1 %vm437_vm1, %v414_v28 }
  0x9b   : > { %v395_v49 = vpop.f32.mrf.mxu3 }
  0x9c   : > { %v371_v29 = vpop.f32.mrf.mxu0  ;;  %v396_v55 = vadd.f32 %v875_v22, %v395_v49 }
  0x9d   : > { %v372_v30 = vadd.f32 %v875_v22, %v371_v29 }
  0x9e   : > { %v423_v56 = vmax.f32 %v396_v55, 0.0  ;;  %v560_v55 = vld [vmem:[%s913_s20 + $0x48] sm:$0xff] }
  0x9f   : > { %v415_v31 = vmax.f32 %v372_v30, 0.0  ;;  %v555_v30 = vld [vmem:[%s913_s20 + $0x20] sm:$0xff] }
  0xa1   : > { %729 = vmatmul.msk.f32.gmra.mxu1 %vm437_vm1, %v415_v31 }
  0xa3   : > { %v398_v54 = vpop.f32.mrf.mxu3 }
  0xa4   : > { %v374_v32 = vpop.f32.mrf.mxu0  ;;  %v399_v58 = vadd.f32 %v875_v22, %v398_v54 }
  0xa5   : > { %v375_v33 = vadd.f32 %v875_v22, %v374_v32 }
  0xa6   : > { %v424_v59 = vmax.f32 %v399_v58, 0.0 }
  0xa7   : > { %v416_v34 = vmax.f32 %v375_v33, 0.0 }
  0xa9   : > { %730 = vmatmul.msk.f32.gmra.mxu1 %vm437_vm1, %v416_v34 }
  0xab   : > { %v401_v57 = vpop.f32.mrf.mxu3 }
  0xac   : > { %v377_v35 = vpop.f32.mrf.mxu0  ;;  %v402_v60 = vadd.f32 %v875_v22, %v401_v57 }
  0xad   : > { %v378_v36 = vadd.f32 %v875_v22, %v377_v35  ;;  %v556_v35 = vld [vmem:[%s913_s20 + $0x28] sm:$0xff] }
  0xae   : > { %v425_v62 = vmax.f32 %v402_v60, 0.0  ;;  %v561_v60 = vld [vmem:[%s913_s20 + $0x50] sm:$0xff] }
  0xaf   : > { %v417_v37 = vmax.f32 %v378_v36, 0.0 }
  0xb1   : > { %731 = vmatmul.msk.f32.gmra.mxu1 %vm437_vm1, %v417_v37 }
  0xb3   : > { %v404_v61 = vpop.f32.mrf.mxu3 }
  0xb4   : > { %v380_v38 = vpop.f32.mrf.mxu0  ;;  %v405_v63 = vadd.f32 %v875_v22, %v404_v61 }
  0xb5   : > { %v381_v39 = vadd.f32 %v875_v22, %v380_v38 }
  0xb6   : > { %v426_v1 = vmax.f32 %v405_v63, 0.0 }
  0xb7   : > { %v418_v40 = vmax.f32 %v381_v39, 0.0 }
  0xb9   : > { %732 = vmatmul.msk.f32.gmra.mxu1 %vm437_vm1, %v418_v40  ;;  %v557_v40 = vld [vmem:[%s913_s20 + $0x30] sm:$0xff] }
  0xbb   : > { %v407_v0 = vpop.f32.mrf.mxu3 }
  0xbc   : > { %v383_v41 = vpop.f32.mrf.mxu0  ;;  %v408_v2 = vadd.f32 %v875_v22, %v407_v0 }
  0xbd   : > { %v384_v42 = vadd.f32 %v875_v22, %v383_v41 }
  0xbe   : > { %v427_v3 = vmax.f32 %v408_v2, 0.0 }
  0xbf   : > { %v419_v43 = vmax.f32 %v384_v42, 0.0 }
  0xc1   : > { %733 = vmatmul.msk.f32.gmra.mxu1 %vm437_vm1, %v419_v43 }
  0xc3   : > { %v410_v4 = vpop.f32.mrf.mxu3 }
  0xc4   : > { %v386_v45 = vpop.f32.mrf.mxu0  ;;  %v411_v5 = vadd.f32 %v875_v22, %v410_v4 }
  0xc5   : > { %v387_v46 = vadd.f32 %v875_v22, %v386_v45  ;;  %v558_v45 = vld [vmem:[%s913_s20 + $0x38] sm:$0xff] }
  0xc6   : > { %v428_v6 = vmax.f32 %v411_v5, 0.0 }
  0xc7   : > { %v420_v47 = vmax.f32 %v387_v46, 0.0 }
  0xc9   : > { %734 = vmatmul.msk.f32.gmra.mxu1 %vm437_vm1, %v420_v47 }
  0xcc   : > { %v389_v48 = vpop.f32.mrf.mxu0 }
  0xcd   : > { %v390_v50 = vadd.f32 %v875_v22, %v389_v48 }
  0xcf   : > { %v421_v51 = vmax.f32 %v390_v50, 0.0  ;;  %v559_v50 = vld [vmem:[%s913_s20 + $0x40] sm:$0xff] }
  0xd1   : > { %735 = vmatmul.msk.f32.vlgmr.msra.gmra.mxu2 %vm437_vm1, %v421_v51 }
  0xd9   : > { %736 = vmatmul.msk.f32.gmra.mxu2 %vm437_vm1, %v422_v53 }
  0xe1   : > { %737 = vmatmul.msk.f32.gmra.mxu2 %vm437_vm1, %v423_v56 }
  0xe9   : > { %738 = vmatmul.msk.f32.gmra.mxu2 %vm437_vm1, %v424_v59 }
  0xf1   : > { %739 = vmatmul.msk.f32.gmra.mxu2 %vm437_vm1, %v425_v62 }
  0xf9   : > { %740 = vmatmul.msk.f32.gmra.mxu2 %vm437_vm1, %v426_v1  ;;  %v562_v1 = vld [vmem:[%s913_s20 + $0x58] sm:$0xff] }
 0x101   : > { %741 = vmatmul.msk.f32.gmra.mxu2 %vm437_vm1, %v427_v3 }
 0x109   : > { %742 = vmatmul.msk.f32.gmra.mxu2 %vm437_vm1, %v428_v6  ;;  %v563_v6 = vld [vmem:[%s913_s20 + $0x60] sm:$0xff] }
 0x10e   : > { %v503_v8 = vpop.f32.mrf.mxu1 }
 0x10f   : > { %v504_v10 = vadd.f32 %v918_v7, %v503_v8 }
 0x111   : > { %v567_v11 = vadd.f32 %v551_v9, %v504_v10 }
 0x113   : > { %vm583_vm3 = vcmp.gt.f32.partialorder %v567_v11, 0.0 }
 0x114   : > { %v599_v13 = vsel %vm583_vm3, 1.0, %v770_v12 }
 0x115   : > { %616 = vst.msk [vmem:[%s926_s26] sm:$0xff] %vm615_vm2, %v599_v13  ;;  %v564_v13 = vld [vmem:[%s913_s20 + $0x68] sm:$0xff] }
 0x116   : > { %v506_v14 = vpop.f32.mrf.mxu1 }
 0x117   : > { %v507_v16 = vadd.f32 %v918_v7, %v506_v14 }
 0x119   : > { %v568_v17 = vadd.f32 %v552_v15, %v507_v16 }
 0x11b   : > { %vm584_vm4 = vcmp.gt.f32.partialorder %v568_v17, 0.0 }
 0x11c   : > { %v600_v18 = vsel %vm584_vm4, 1.0, %v770_v12 }
 0x11d   : > { %617 = vst.msk [vmem:[%s926_s26 + $0x8] sm:$0xff] %vm615_vm2, %v600_v18  ;;  %v565_v18 = vld [vmem:[%s913_s20 + $0x70] sm:$0xff] }
 0x11e   : > { %v509_v19 = vpop.f32.mrf.mxu1 }
 0x11f   : > { %v510_v21 = vadd.f32 %v918_v7, %v509_v19 }
 0x121   : > { %v569_v22 = vadd.f32 %v553_v20, %v510_v21 }
 0x123   : > { %vm585_vm5 = vcmp.gt.f32.partialorder %v569_v22, 0.0 }
 0x124   : > { %v601_v23 = vsel %vm585_vm5, 1.0, %v770_v12 }
 0x125   : > { %618 = vst.msk [vmem:[%s926_s26 + $0x10] sm:$0xff] %vm615_vm2, %v601_v23  ;;  %v566_v23 = vld [vmem:[%s913_s20 + $0x78] sm:$0xff] }
 0x126   : > { %v512_v24 = vpop.f32.mrf.mxu1 }
 0x127   : > { %v513_v26 = vadd.f32 %v918_v7, %v512_v24 }
 0x129   : > { %v570_v27 = vadd.f32 %v554_v25, %v513_v26 }
 0x12b   : > { %vm586_vm6 = vcmp.gt.f32.partialorder %v570_v27, 0.0 }
 0x12c   : > { %v602_v28 = vsel %vm586_vm6, 1.0, %v770_v12 }
 0x12d   : > { %619 = vst.msk [vmem:[%s926_s26 + $0x18] sm:$0xff] %vm615_vm2, %v602_v28 }
 0x12e   : > { %v515_v29 = vpop.f32.mrf.mxu1 }
 0x12f   : > { %v516_v31 = vadd.f32 %v918_v7, %v515_v29 }
 0x131   : > { %v571_v32 = vadd.f32 %v555_v30, %v516_v31 }
 0x133   : > { %vm587_vm7 = vcmp.gt.f32.partialorder %v571_v32, 0.0 }
 0x134   : > { %v603_v33 = vsel %vm587_vm7, 1.0, %v770_v12 }
 0x135   : > { %620 = vst.msk [vmem:[%s926_s26 + $0x20] sm:$0xff] %vm615_vm2, %v603_v33 }
 0x136   : > { %v518_v34 = vpop.f32.mrf.mxu1 }
 0x137   : > { %v519_v36 = vadd.f32 %v918_v7, %v518_v34 }
 0x139   : > { %v572_v37 = vadd.f32 %v556_v35, %v519_v36 }
 0x13b   : > { %vm588_vm8 = vcmp.gt.f32.partialorder %v572_v37, 0.0 }
 0x13c   : > { %v604_v38 = vsel %vm588_vm8, 1.0, %v770_v12 }
 0x13d   : > { %621 = vst.msk [vmem:[%s926_s26 + $0x28] sm:$0xff] %vm615_vm2, %v604_v38 }
 0x13e   : > { %v521_v39 = vpop.f32.mrf.mxu1 }
 0x13f   : > { %v522_v41 = vadd.f32 %v918_v7, %v521_v39 }
 0x141   : > { %v573_v42 = vadd.f32 %v557_v40, %v522_v41 }
 0x143   : > { %vm589_vm9 = vcmp.gt.f32.partialorder %v573_v42, 0.0 }
 0x144   : > { %v605_v43 = vsel %vm589_vm9, 1.0, %v770_v12 }
 0x145   : > { %622 = vst.msk [vmem:[%s926_s26 + $0x30] sm:$0xff] %vm615_vm2, %v605_v43 }
 0x146   : > { %v524_v44 = vpop.f32.mrf.mxu1 }
 0x147   : > { %v525_v46 = vadd.f32 %v918_v7, %v524_v44 }
 0x149   : > { %v574_v47 = vadd.f32 %v558_v45, %v525_v46 }
 0x14b   : > { %vm590_vm10 = vcmp.gt.f32.partialorder %v574_v47, 0.0 }
 0x14c   : > { %v606_v48 = vsel %vm590_vm10, 1.0, %v770_v12 }
 0x14d   : > { %623 = vst.msk [vmem:[%s926_s26 + $0x38] sm:$0xff] %vm615_vm2, %v606_v48 }
 0x154   : > { %v527_v49 = vpop.f32.mrf.mxu2 }
 0x155   : > { %v528_v51 = vadd.f32 %v918_v7, %v527_v49 }
 0x157   : > { %v575_v52 = vadd.f32 %v559_v50, %v528_v51 }
 0x159   : > { %vm591_vm11 = vcmp.gt.f32.partialorder %v575_v52, 0.0 }
 0x15a   : > { %v607_v53 = vsel %vm591_vm11, 1.0, %v770_v12 }
 0x15b   : > { %624 = vst.msk [vmem:[%s926_s26 + $0x40] sm:$0xff] %vm615_vm2, %v607_v53 }
 0x15c   : > { %v530_v54 = vpop.f32.mrf.mxu2 }
 0x15d   : > { %v531_v56 = vadd.f32 %v918_v7, %v530_v54 }
 0x15f   : > { %v576_v57 = vadd.f32 %v560_v55, %v531_v56 }
 0x161   : > { %vm592_vm12 = vcmp.gt.f32.partialorder %v576_v57, 0.0 }
 0x162   : > { %v608_v58 = vsel %vm592_vm12, 1.0, %v770_v12 }
 0x163   : > { %625 = vst.msk [vmem:[%s926_s26 + $0x48] sm:$0xff] %vm615_vm2, %v608_v58 }
 0x164   : > { %v533_v59 = vpop.f32.mrf.mxu2 }
 0x165   : > { %v534_v61 = vadd.f32 %v918_v7, %v533_v59 }
 0x167   : > { %v577_v62 = vadd.f32 %v561_v60, %v534_v61 }
 0x169   : > { %vm593_vm13 = vcmp.gt.f32.partialorder %v577_v62, 0.0 }
 0x16a   : > { %v609_v63 = vsel %vm593_vm13, 1.0, %v770_v12 }
 0x16b   : > { %626 = vst.msk [vmem:[%s926_s26 + $0x50] sm:$0xff] %vm615_vm2, %v609_v63 }
 0x16c   : > { %v536_v0 = vpop.f32.mrf.mxu2 }
 0x16d   : > { %v537_v2 = vadd.f32 %v918_v7, %v536_v0 }
 0x16f   : > { %v578_v3 = vadd.f32 %v562_v1, %v537_v2 }
 0x171   : > { %vm594_vm14 = vcmp.gt.f32.partialorder %v578_v3, 0.0 }
 0x172   : > { %v610_v4 = vsel %vm594_vm14, 1.0, %v770_v12 }
 0x173   : > { %627 = vst.msk [vmem:[%s926_s26 + $0x58] sm:$0xff] %vm615_vm2, %v610_v4 }
 0x174   : > { %v539_v5 = vpop.f32.mrf.mxu2 }
 0x175   : > { %v540_v8 = vadd.f32 %v918_v7, %v539_v5 }
 0x177   : > { %v579_v9 = vadd.f32 %v563_v6, %v540_v8 }
 0x179   : > { %vm595_vm15 = vcmp.gt.f32.partialorder %v579_v9, 0.0 }
 0x17a   : > { %v611_v10 = vsel %vm595_vm15, 1.0, %v770_v12 }
 0x17b   : > { %628 = vst.msk [vmem:[%s926_s26 + $0x60] sm:$0xff] %vm615_vm2, %v611_v10 }
 0x17c   : > { %v542_v11 = vpop.f32.mrf.mxu2 }
 0x17d   : > { %v543_v14 = vadd.f32 %v918_v7, %v542_v11 }
 0x17f   : > { %v580_v15 = vadd.f32 %v564_v13, %v543_v14 }
 0x181   : > { %vm596_vm0 = vcmp.gt.f32.partialorder %v580_v15, 0.0 }
 0x182   : > { %v612_v16 = vsel %vm596_vm0, 1.0, %v770_v12 }
 0x183   : > { %629 = vst.msk [vmem:[%s926_s26 + $0x68] sm:$0xff] %vm615_vm2, %v612_v16 }
 0x184   : > { %v545_v17 = vpop.f32.mrf.mxu2 }
 0x185   : > { %v546_v19 = vadd.f32 %v918_v7, %v545_v17 }
 0x187   : > { %v581_v20 = vadd.f32 %v565_v18, %v546_v19 }
 0x189   : > { %vm597_vm1 = vcmp.gt.f32.partialorder %v581_v20, 0.0 }
 0x18a   : > { %v613_v21 = vsel %vm597_vm1, 1.0, %v770_v12 }
 0x18b   : > { %630 = vst.msk [vmem:[%s926_s26 + $0x70] sm:$0xff] %vm615_vm2, %v613_v21 }
 0x18c   : > { %v548_v22 = vpop.f32.mrf.mxu2 }
 0x18d   : > { %v549_v24 = vadd.f32 %v918_v7, %v548_v22 }
 0x18f   : > { %v582_v25 = vadd.f32 %v566_v23, %v549_v24 }
 0x191   : > { %vm598_vm3 = vcmp.gt.f32.partialorder %v582_v25, 0.0 }
 0x192   : > { %v614_v26 = vsel %vm598_vm3, 1.0, %v770_v12 }
 0x193   : > { %631 = vst.msk [vmem:[%s926_s26 + $0x78] sm:$0xff] %vm615_vm2, %v614_v26 }
 0x194 PF: > { %s16_s21 = sadd.s32 1, %s768_s21  }
 0x195   : > { %p13_p4 = scmp.ge.s32.totalorder %s16_s21, 4  }
 0x197   :  { %15 = sbr.rel (!%p13_p4) target bundleno = 1 (0x1), region = 77 }

</bundles_post_ra>
